<compile_context>
chip_gen: v6e
topology: v6e:2x2x1
jax: 0.10.0
libtpu: 0.0.40
codegen_flags: <defaults>
</compile_context>

<pallas_src>
import jax
import jax.numpy as jnp
from jax.experimental import pallas as pl
from jax.experimental.pallas import tpu as pltpu

_MIB = 1024 * 1024


def _cdiv(a: int, b: int) -> int:
    return -(-a // b)


def _pos_param_kernel(x_ref, pe_ref, o_ref):
    # x_ref : (TL, D_x)      row tile of the current batch element
    # pe_ref: (TL, P)        matching row tile of the positional parameter
    # o_ref : (TL, D_x + P)  same rows of the output
    d_x = x_ref.shape[-1]
    # x slab -> first D_x output lanes (lane-dense when D_x % 128 == 0).
    o_ref[:, :d_x] = x_ref[...].astype(o_ref.dtype)
    # pe slab -> remaining lanes.  If D_x % 128 != 0 this whole store is
    # lane-misaligned (masked / lane-shifted), not just the boundary vreg.
    o_ref[:, d_x:] = pe_ref[...].astype(o_ref.dtype)


def _sublane_multiple(*dtypes) -> int:
    """Native sublane packing multiple (8 f32, 16 bf16, 32 int8/fp8)."""
    m = 8
    for dt in dtypes:
        m = max(m, 32 // max(1, jnp.dtype(dt).itemsize))
    return m


def _vmem_budget_and_limit():
    """Per-generation (tile budget, vmem_limit_bytes).

    v5e / v6e have 128 MiB physical VMEM -> big tiles.  v7x (or unknown) has
    64 MiB -> keep the double-buffered footprint well under it.
    """
    physical = None
    try:
        physical = getattr(pltpu.get_tpu_info(), "vmem_capacity_bytes", None)
    except Exception:
        physical = None
    if physical is not None and physical >= 128 * _MIB:
        return 80 * _MIB, 100 * _MIB          # v5e / v6e
    return 36 * _MIB, 48 * _MIB               # v7x / conservative fallback


def _choose_tiling(B, L, Dx, P, x_dt, pe_dt, out_dt, vmem_budget, sublane):
    """Row tile TL and tile count n_l, sized by BYTES against the VMEM budget."""
    # Double-buffered x + pe + out tiles, per row:
    bytes_per_row = 2 * (
        Dx * jnp.dtype(x_dt).itemsize
        + P * jnp.dtype(pe_dt).itemsize
        + (Dx + P) * jnp.dtype(out_dt).itemsize
    )
    tl_cap = max(sublane,
                 (vmem_budget // max(1, bytes_per_row)) // sublane * sublane)
    if L <= tl_cap:
        tl = L                                # full-extent block is always legal
    else:
        n_l = _cdiv(L, tl_cap)
        tl = min(tl_cap, _cdiv(_cdiv(L, n_l), sublane) * sublane)  # even split
    n_l = _cdiv(L, tl)
    # v7x: guarantee >= 2 grid steps so both TensorCores get work
    # (neutral on single-TC v5e/v6e).
    if B * n_l < 2 and L >= 2 * sublane:
        tl = _cdiv(_cdiv(L, 2), sublane) * sublane
        n_l = _cdiv(L, tl)
    return tl, n_l


def positional_parameter(x: jax.Array, pe: jax.Array) -> jax.Array:
    """Equivalent of PositionalParameter.forward.

    x : (B, L, D_x)
    pe: (L, P)           (max_len == L must match x's seq length)
    returns (B, L, D_x + P), dtype = promote_types(x.dtype, pe.dtype).
    """
    B, L, Dx = x.shape
    Lp, P = pe.shape
    assert Lp == L, "pe max_len must match x seq length"

    out_dtype = jnp.promote_types(x.dtype, pe.dtype)
    sublane = _sublane_multiple(x.dtype, pe.dtype, out_dtype)
    vmem_budget, vmem_limit = _vmem_budget_and_limit()
    TL, n_l = _choose_tiling(B, L, Dx, P, x.dtype, pe.dtype, out_dtype,
                             vmem_budget, sublane)

    out_shape = jax.ShapeDtypeStruct((B, L, Dx + P), out_dtype)

    # TODO(synk): if Dx >> P, the x slab could bypass VMEM entirely via a
    # strided HBM->HBM DMA (memory_space=pl.ANY) with the kernel writing only
    # the pe lanes; not worth the complexity at these sizes.
    return pl.pallas_call(
        _pos_param_kernel,
        out_shape=out_shape,
        grid_spec=pltpu.PrefetchScalarGridSpec(
            num_scalar_prefetch=0,
            # Batch innermost: pe's block index (l, 0) is constant across the
            # B consecutive inner steps, so its HBM fetch is not repeated.
            grid=(n_l, B),
            in_specs=[
                # x: one (TL, Dx) row tile; batch dim squeezed out of the
                # kernel view so the body works on plain 2-D tiles.
                pl.BlockSpec((None, TL, Dx), lambda l, b: (b, l, 0)),
                # pe: matching (TL, P) row tile, revisited across batches.
                pl.BlockSpec((TL, P), lambda l, b: (l, 0)),
            ],
            out_specs=pl.BlockSpec((None, TL, Dx + P),
                                   lambda l, b: (b, l, 0)),
        ),
        compiler_params=pltpu.CompilerParams(
            # Pure copy kernel: every (row-tile, batch) block is independent.
            dimension_semantics=("parallel", "parallel"),
            vmem_limit_bytes=vmem_limit,
        ),
    )(x, pe)


if __name__ == "__main__":
    # Small shapes consistent with the module: B=2, max_len=8, D_x=32, pe_dim=32.
    B, L, Dx, P = 2, 8, 32, 32

    key = jax.random.PRNGKey(0)
    k_x, k_pe = jax.random.split(key)
    x = jax.random.normal(k_x, (B, L, Dx), dtype=jnp.float32)
    # Deterministic "parameter" init (stand-in for torch.randn(max_len, pe_dim)).
    pe = jax.random.normal(k_pe, (L, P), dtype=jnp.float32)

    out = jax.block_until_ready(positional_parameter(x, pe))

    # Reference check in plain JAX (mirrors the PyTorch forward exactly).
    ref = jnp.concatenate(
        [x, jnp.broadcast_to(pe[None, :, :], (B, L, P))], axis=2
    )
    assert out.shape == (B, L, Dx + P)
    assert out.dtype == ref.dtype
    assert jnp.allclose(out, ref), "Pallas output mismatch vs reference"

    print("KERNEL_OK")
</pallas_src>

<mosaic_0001>
module attributes {stable_mosaic.version = 11 : i64} {
  func.func @_pos_param_kernel(%arg0: i32, %arg1: i32, %arg2: memref<1x8x32xf32, #tpu.memory_space<vmem>>, %arg3: memref<8x32xf32, #tpu.memory_space<vmem>>, %arg4: memref<1x8x64xf32, #tpu.memory_space<vmem>>) attributes {dimension_semantics = [#tpu.dimension_semantics<parallel>, #tpu.dimension_semantics<parallel>], iteration_bounds = array<i64: 1, 2>, scalar_prefetch = 0 : i64, scratch_operands = 0 : i64, tpu.core_type = #tpu.core_type<tc>, window_params = [{transform_indices = @transform_0, window_bounds = array<i64: 1, 8, 32>}, {transform_indices = @transform_1, window_bounds = array<i64: 8, 32>}, {transform_indices = @transform_2, window_bounds = array<i64: 1, 8, 64>}]} {
    %c0 = arith.constant 0 : index
    %c0_0 = arith.constant 0 : index
    %c0_1 = arith.constant 0 : index
    %0 = vector.load %arg2[%c0, %c0_0, %c0_1] : memref<1x8x32xf32, #tpu.memory_space<vmem>>, vector<1x8x32xf32>
    %1 = vector.shape_cast %0 : vector<1x8x32xf32> to vector<8x32xf32>
    %c0_2 = arith.constant 0 : index
    %c0_3 = arith.constant 0 : index
    %c0_4 = arith.constant 0 : index
    %2 = vector.load %arg4[%c0_2, %c0_3, %c0_4] : memref<1x8x64xf32, #tpu.memory_space<vmem>>, vector<1x8x32xf32>
    %3 = vector.shape_cast %2 : vector<1x8x32xf32> to vector<8x32xf32>
    %4 = vector.shape_cast %1 : vector<8x32xf32> to vector<1x8x32xf32>
    tpu.vector_store %arg4[%c0_2, %c0_3, %c0_4], %4 {strides = array<i32>} : memref<1x8x64xf32, #tpu.memory_space<vmem>>, vector<1x8x32xf32>,
    %c0_5 = arith.constant 0 : index
    %c0_6 = arith.constant 0 : index
    %5 = vector.load %arg3[%c0_5, %c0_6] : memref<8x32xf32, #tpu.memory_space<vmem>>, vector<8x32xf32>
    %c0_7 = arith.constant 0 : index
    %c0_8 = arith.constant 0 : index
    %c32 = arith.constant 32 : index
    %6 = vector.load %arg4[%c0_7, %c0_8, %c32] : memref<1x8x64xf32, #tpu.memory_space<vmem>>, vector<1x8x32xf32>
    %7 = vector.shape_cast %6 : vector<1x8x32xf32> to vector<8x32xf32>
    %8 = vector.shape_cast %5 : vector<8x32xf32> to vector<1x8x32xf32>
    tpu.vector_store %arg4[%c0_7, %c0_8, %c32], %8 {strides = array<i32>} : memref<1x8x64xf32, #tpu.memory_space<vmem>>, vector<1x8x32xf32>,
    return
  }
  func.func @transform_0(%arg0: i32, %arg1: i32) -> (i32, i32, i32) {
    %c0_i32 = arith.constant 0 : i32
    %c0_i32_0 = arith.constant 0 : i32
    return %arg1, %arg0, %c0_i32 : i32, i32, i32
  }
  func.func @transform_1(%arg0: i32, %arg1: i32) -> (i32, i32) {
    %c0_i32 = arith.constant 0 : i32
    %c0_i32_0 = arith.constant 0 : i32
    return %arg0, %c0_i32 : i32, i32
  }
  func.func @transform_2(%arg0: i32, %arg1: i32) -> (i32, i32, i32) {
    %c0_i32 = arith.constant 0 : i32
    %c0_i32_0 = arith.constant 0 : i32
    return %arg1, %arg0, %c0_i32 : i32, i32, i32
  }
}

</mosaic_0001>

<bundles_post_ra>
// kernel: tpu_custom_call.1
= control target key start
LH: loop header
LB: loop body
LE: loop exit
PB: predicated region body
PF: predicated region fallthrough
CT: control target
= control target key end

     0   :  { %7 = vsyncpa [#allocation3], 0  ;;  %s728_s0 = inlined_call_operand.hbm [shape: f32[2,8,32], index: 0, kind: input, shape index: {}]   ;;  %s729_s1 = inlined_call_operand.hbm [shape: f32[8,32], index: 1, kind: input, shape index: {}]   ;;  %s730_s2 = inlined_call_operand.hbm [shape: f32[2,8,64], index: 2, kind: output, shape index: {}]  }
   0x1   :  { %9 = vsyncpa [#allocation3 + $0x1], 0 }
   0x2   :  { %10 = vsyncpa [#allocation6], 0 }
   0x3   :  { %11 = vsyncpa [#allocation4], 0 }
   0x4   :  { %13 = vsyncpa [#allocation4 + $0x1], 0  ;;  %s561_s9 = smov 0   ;;  %s563_s10 = smov 0  }
   0x5   :  { %s565_s11 = smov 0   ;;  %s567_s12 = smov 0  }
   0x6   :  { %s569_s13 = smov 0   ;;  %s571_s14 = smov 0  }
   0x7 LB: > { %s313_s15 = sadd.s32 4294967295, %s540_s14   ;;  %s314_s16 = sadd.s32 4294967294, %s540_s14   ;;  %s540_s14 = sphi %s571_s14, %s19_s14   ;;  %s536_s13 = sphi %s569_s13, %s747_s13   ;;  %s532_s12 = sphi %s567_s12, %s746_s12   ;;  %s528_s11 = sphi %s565_s11, %s745_s11   ;;  %s524_s10 = sphi %s563_s10, %s744_s10   ;;  %s520_s9 = sphi %s561_s9, %s743_s9  }
   0x8   : > { %p53_p0 = scmp.ne.s32.totalorder %s524_s10, %s520_s9  ;;  %p595_p1 = scmp.eq.s32.totalorder %s313_s15, 0 }
   0x9   : > { %p599_p2 = scmp.eq.s32.totalorder %s313_s15, 1  ;;  %p111_p3 = scmp.eq.s32.totalorder %s314_s16, 1 }
   0xa   : > { %p605_p4 = por %p595_p1, %p53_p0  ;;  %p315_p5 = scmp.ge.s32.totalorder %s540_s14, 1 }
   0xb   : > { %p610_p6 = por %p111_p3, %p53_p0  ;;  %p118_p7 = scmp.lt.s32.totalorder %s540_s14, 3 }
   0xc   : > { %s734_s19 = scalar_select %p605_p4, 1, 0 }
   0xd   : > { %s735_s20 = scalar_select %p610_p6, 1, 0 }
   0xe   : > { %p615_p8 = pnand %p315_p5, %p118_p7  ;;  %s542_s22 = smov [#allocation5]  }
   0xf   : > { %s133_s23 = sshll.u32 %s542_s22, 4  ;;  %s28_s25 = sadd.s32 1, %s536_s13  ;;  %s134_s23 = int_to_ptr.vmem [resolvable:$true] %s133_s23 }
  0x10   : > { %p336_p10 = pneg %p615_p8  ;;  %s40_s26 = sadd.s32 1, %s528_s11 }
  0x11   : > { %p29_p12 = scmp.ge.s32.totalorder %s28_s25, 2  ;;  %s413_s27 = scalar_lea.vmem %s134_s23, 128 }
  0x12   : > { %p624_p11 = pnand %p336_p10, %p595_p1  ;;  %p414_p0 = scmp.ne.s32.totalorder %s134_s23, %s413_s27 }
  0x13   : > { %p421_p7 = scmp.lt.s32.totalorder %s134_s23, %s134_s23  ;;  %p422_p6 = scmp.lt.s32.totalorder %s413_s27, %s413_s27 }
  0x14   : > { %p404_p13 = pneg %p624_p11 }
  0x15   : > { %p423_p9 = por %p422_p6, %p421_p7 }
  0x16   : > { %p416_p3 = pnand %p414_p0, %p404_p13 }
  0x18   : > { %p417_p5 = pneg %p416_p3 }
  0x1a   : > { %p424_p4 = pnand %p423_p9, %p417_p5 }
  0x1c   : > { %427 = shalt.err (!%p424_p4)
}
  0x1d   : > { %339 = dma.hbm_to_vmem [thread:$0]  (!%p624_p11), %s729_s1, 128, %s134_s23, [#allocation6]  }
  0x1e   : > { %s749_s25 = smov (%p29_p12, %s28_s25), 0  ;;  %p47_p6 = scmp.ne.s32.totalorder %s528_s11, %s524_s10 }
  0x1f   : > { %p48_p4 = scmp.eq.s32.totalorder %s540_s14, 0  ;;  %s35_s30 = ssub.s32 %s536_s13, %s749_s25 }
  0x20   : > { %p349_p9 = scmp.lt.s32.totalorder %s540_s14, 2  ;;  %p38_p10 = scmp.eq.s32.totalorder %s35_s30, 0 }
  0x21   : > { %p49_p13 = por %p48_p4, %p47_p6  ;;  %p647_p0 = por %p599_p2, %p47_p6 }
  0x22   : > { %s144_s4 = sand.u32 1, %s528_s11   ;;  %s319_s7 = sshll.u32 %s536_s13, 7 }
  0x23   : > { %s653_s5 = scalar_select %p38_p10, %s528_s11, %s40_s26  }
  0x24   : > { %s318_s6 = sshll.u32 %s144_s4, 3  ;;  %s154_s16 = scalar_lea.hbm %s728_s0, %s319_s7 }
  0x25   : > { %s148_s22 = scalar_lea.vmem [#allocation2], %s318_s6  ;;  %p659_p11 = pnand %p349_p9, %p49_p13 }
  0x26   : > { %s156_s23 = sshll.u32 %s148_s22, 4  ;;  %s145_s18 = scalar_lea.sflag [#allocation3], %s144_s4  ;;  %s157_s23 = int_to_ptr.vmem [resolvable:$true] %s156_s23 }
  0x27   : > { %p430_p2 = pneg %p659_p11  ;;  %s441_s27 = scalar_lea.vmem %s157_s23, 128 }
  0x28   : > { %p442_p12 = scmp.ne.s32.totalorder %s157_s23, %s441_s27  ;;  %s543_s26 = smov [#allocation2]  }
  0x29   : > { %s446_s28 = sshll.u32 %s543_s26, 4  ;;  %s447_s28 = int_to_ptr.vmem [resolvable:$false] %s446_s28 }
  0x2a   : > { %p444_p3 = pnand %p442_p12, %p430_p2  ;;  %s448_s29 = scalar_lea.vmem %s447_s28, 256 }
  0x2b   : > { %p449_p7 = scmp.lt.s32.totalorder %s157_s23, %s447_s28  ;;  %p450_p6 = scmp.lt.s32.totalorder %s448_s29, %s441_s27 }
  0x2c   : > { %p445_p5 = pneg %p444_p3 }
  0x2d   : > { %p451_p4 = por %p450_p6, %p449_p7 }
  0x2f   : > { %p452_p10 = pnand %p451_p4, %p445_p5 }
  0x31   : > { %455 = shalt.err (!%p452_p10)
}
  0x32   : > { %343 = dma.hbm_to_vmem [thread:$0]  (!%p659_p11), %s154_s16, 128, %s157_s23, %s145_s18  }
  0x33   : > { %165 = sbr.rel (%p615_p8) target bundleno = 189 (0xbd), region = 28  ;;  %s670_s30 = sand.u32 (!%p615_p8), 1, %s524_s10  }
  0x34   : > { %s321_s4 = sshll.u32 (!%p615_p8), %s670_s30, 3  ;;  %s168_s6 = scalar_lea.sflag (!%p615_p8), [#allocation3], %s670_s30 }
  0x35   : > { %s171_s7 = scalar_lea.vmem (!%p615_p8), [#allocation2], %s321_s4  ;;  %p740_p9 = scmp.ne.s32.totalorder (!%p615_p8), %s734_s19, 0 }
  0x38   : > { %507 = dma.done.wait (%p740_p9), %s168_s6, 128  }
  0x39   : > { %509 = vsyncadd (%p740_p9), %s168_s6, 4294967168 }
  0x3a   : > { %511 = dma.done.wait (%p595_p1), [#allocation6], 128  }
  0x3b   : > { %513 = vsyncadd (%p595_p1), [#allocation6], 4294967168  ;;  %vm197_vm0 = vcmask 261120   ;;  %v196_v0 = vld [vmem:[%s171_s7] sm:$0xff]  ;;  %v199_v1 = vld [vmem:[#allocation5] sm:$0xff]  ;;  %s195_s21 = scalar_lea.vmem [#allocation7], %s321_s4 }
  0x3c   : > { %198 = vst.msk [vmem:[%s195_s21] sm:$0xff] %vm197_vm0, %v196_v0  ;;  %s544_s8 = smov 32   ;;  %s325_s15 = sshll.u32 %s532_s12, 7  ;;  %vm204_vm1 = vcmask 523520  }
  0x3d   : > { %201 = vrot.lane.b32.xlu0 %v199_v1, %s544_s8  ;;  %s221_s16 = sshll.u32 %s195_s21, 4  ;;  %s686_s23 = scalar_lea.hbm %s730_s2, %s325_s15  ;;  %s222_s16 = int_to_ptr.vmem [resolvable:$true] %s221_s16 }
  0x3e   : > { %s207_s17 = scalar_lea.sflag [#allocation4], %s670_s30  ;;  %s456_s24 = scalar_lea.vmem %s222_s16, 128 }
  0x3f   : > { %p457_p1 = scmp.ne.s32.totalorder %s222_s16, %s456_s24  ;;  %s545_s18 = smov [#allocation7]  }
  0x40   : > { %s460_s27 = sshll.u32 %s545_s18, 4  ;;  %s461_s27 = int_to_ptr.vmem [resolvable:$false] %s460_s27 }
  0x41   : > { %p458_p8 = pnand %p457_p1, %p647_p0  ;;  %s462_s12 = scalar_lea.vmem %s461_s27, 256 }
  0x42   : > { %p463_p11 = scmp.lt.s32.totalorder %s222_s16, %s461_s27  ;;  %p464_p2 = scmp.lt.s32.totalorder %s462_s12, %s456_s24 }
  0x43   : > { %p459_p13 = pneg %p458_p8 }
  0x44   : > { %p465_p12 = por %p464_p2, %p463_p11 }
  0x46   : > { %p466_p3 = pnand %p465_p12, %p459_p13 }
  0xaf   : > { %v202_v2 = vpop.permute.xlu0 %201 }
  0xb0   : > { %205 = vst.msk [vmem:[%s195_s21] sm:$0xff] %vm204_vm1, %v202_v2 }
  0xb1   : > { %469 = shalt.err (!%p466_p3)
}
  0xb2   : > { %s470_s26 = scalar_lea.hbm %s686_s23, 128  ;;  %s474_s30 = scalar_lea.hbm %s730_s2, 256 }
  0xb3   : > { %p471_p5 = scmp.ne.s32.totalorder %s686_s23, %s470_s26  ;;  %p475_p4 = scmp.lt.s32.totalorder %s686_s23, %s730_s2 }
  0xb4   : > { %p476_p10 = scmp.lt.s32.totalorder %s474_s30, %s470_s26 }
  0xb5   : > { %p472_p7 = pnand %p471_p5, %p647_p0 }
  0xb6   : > { %p477_p9 = por %p476_p10, %p475_p4 }
  0xb7   : > { %p473_p6 = pneg %p472_p7 }
  0xb9   : > { %p478_p1 = pnand %p477_p9, %p473_p6 }
  0xbb   : > { %481 = shalt.err (!%p478_p1)
}
  0xbc   : > { %334 = dma.vmem_to_hbm [thread:$0]  (%p647_p0), %s222_s16, 128, %s686_s23, %s207_s17  }
  0xbd PF: > { %s233_s7 = sand.u32 1, %s520_s9   ;;  %p741_p8 = scmp.ne.s32.totalorder %s735_s20, 0 }
  0xbe   : > { %p742_p13 = scmp.ge.s32.totalorder %s540_s14, 2  ;;  %s234_s21 = scalar_lea.sflag [#allocation4], %s233_s7 }
  0xc0   : > { %p345_p11 = pnand %p742_p13, %p741_p8 }
  0xc2   : > { %p346_p2 = pneg %p345_p11 }
  0xc4   : > { %515 = dma.done.wait (%p346_p2), %s234_s21, 128  }
  0xc5   : > { %517 = vsyncadd (%p346_p2), %s234_s21, 4294967168  ;;  %s19_s14 = sadd.s32 1, %s540_s14   ;;  %s743_s9 = smov %s524_s10 }
  0xc6   : > { %p16_p12 = scmp.ge.s32.totalorder %s19_s14, 4   ;;  %s744_s10 = smov %s528_s11 }
  0xc7   : > { %s745_s11 = smov %s653_s5  ;;  %s746_s12 = smov %s536_s13 }
  0xc8   : > { %s747_s13 = smov %s749_s25  ;;  %18 = sbr.rel (!%p16_p12) target bundleno = 7 (0x7), region = 78 }
  0xcd   :  { %239 = vsyncpa [#allocation3], 1 }
  0xce   :  { %241 = vsyncpa [#allocation3 + $0x1], 1 }
  0xcf   :  { %242 = vsyncpa [#allocation6], 1 }
  0xd0   :  { %243 = vsyncpa [#allocation4], 1 }
  0xd1   :  { %245 = vsyncpa [#allocation4 + $0x1], 1 }

</bundles_post_ra>
